<compile_context>
chip_gen: v5e
topology: v5e:2x2
jax: 0.10.0
libtpu: 0.0.40
codegen_flags: <defaults>
</compile_context>

<pallas_src>
import math

import jax
import jax.numpy as jnp
from jax.experimental import pallas as pl
from jax.experimental.pallas import tpu as pltpu

_LANE = 128
_SUBLANE = 8


def _normalize_kernel(x_ref, scale_ref, bias_ref, o_ref):
    # x_ref / o_ref : (rb, cb) lane-dense tile of the flattened image.
    # scale_ref / bias_ref : (rb, 1) f32 FMA constants, resident in VMEM
    # (constant index_map -> fetched once), broadcast over lanes.
    x = x_ref[...].astype(jnp.float32)
    o_ref[...] = (x * scale_ref[...] + bias_ref[...]).astype(o_ref.dtype)


def _block_budget_bytes():
    """Per-array per-block VMEM budget, chosen per TPU generation."""
    try:
        kind = jax.devices()[0].device_kind.lower()
    except Exception:
        kind = ""
    if "v7" in kind:
        return 6 * 1024 * 1024   # 3.2 TB/s HBM but only 64 MiB VMEM per TC
    if "v6" in kind:
        return 4 * 1024 * 1024   # ~1.4 TB/s HBM, 128 MiB VMEM
    return 3 * 1024 * 1024       # v5e & unknown generations: conservative


def _round_up(x, m):
    return -(-x // m) * m


def _pick_tiles(rows, cols, channels, itemsize, sub, budget):
    """Pick (rb, cb) respecting the (8,128) rule, dtype packing and budget."""
    # rb quantum: multiple of the sublane tile AND of C, so the per-row
    # scale/bias pattern is identical for every row block.
    rq = channels * sub // math.gcd(channels, sub)

    # Column block first: full cols when it fits with the minimal row block,
    # otherwise near-equal 128-aligned chunks (balanced, mostly-unmasked vst).
    max_cb = max(_LANE, (budget // (rq * itemsize)) // _LANE * _LANE)
    if cols <= max_cb:
        cb = cols
    else:
        n_cb = pl.cdiv(cols, max_cb)
        cb = _round_up(pl.cdiv(cols, n_cb), _LANE)

    # Row block: grow until the block reaches the budget (do NOT cap at 8
    # sublanes -- small-spatial inputs need many rows per block).
    max_rb = budget // (cb * itemsize)
    if rows <= max_rb:
        rb = rows                        # full extent; rows = N*C is a multiple of C
    else:
        rb = max(rq, (max_rb // rq) * rq)
    return rb, cb


def image_normalize(x, mean, std, *, donate_input=False):
    """(x - mean) / std with mean/std broadcast per channel (dim 1)."""
    N, C, H, W = x.shape
    mean_f = jnp.asarray(mean, dtype=jnp.float32).reshape(-1)
    std_f = jnp.asarray(std, dtype=jnp.float32).reshape(-1)

    # Fused multiply-add rewrite: y = x * (1/std) + (-mean/std).
    # (Differs from (x-mean)/std only by rounding ulps.)
    scale_c = 1.0 / std_f
    bias_c = -mean_f * scale_c

    # Torch promotes (int/bf16 x - float32 buffer) to float32; do the same.
    out_dtype = jnp.dtype(jnp.float32)

    rows, cols = N * C, H * W
    x2 = x.reshape(rows, cols)   # free reshape: merges adjacent dims

    in_item = jnp.dtype(x.dtype).itemsize
    out_item = out_dtype.itemsize
    itemsize = max(in_item, out_item)
    sub = max(_SUBLANE, 32 // min(in_item, out_item))   # 8 f32, 16 bf16, 32 int8
    budget = _block_budget_bytes()

    rb, cb = _pick_tiles(rows, cols, C, itemsize, sub, budget)

    # v7x has two TensorCores: ensure at least 2 blocks on a "parallel" axis
    # so both cores get work (costs at most one extra ~0.35us step elsewhere).
    if pl.cdiv(rows, rb) * pl.cdiv(cols, cb) == 1 and cols >= 2 * _LANE:
        cb = _round_up(pl.cdiv(cols, 2), _LANE)

    grid = (pl.cdiv(rows, rb), pl.cdiv(cols, cb))

    # Per-row FMA constants for ONE row block.  rb is always a multiple of C,
    # so every row block sees the same (rb, 1) pattern -> constant index_map,
    # fetched once, zero per-step scale/bias DMA traffic.
    reps = rb // C
    scale_blk = jnp.tile(scale_c, reps).reshape(rb, 1)
    bias_blk = jnp.tile(bias_c, reps).reshape(rb, 1)

    x_spec = pl.BlockSpec((rb, cb), lambda r, s: (r, s))
    const_spec = pl.BlockSpec((rb, 1), lambda r, s: (0, 0))

    # VMEM budget: double-buffered in+out blocks + lane-padded scale/bias
    # ((rb,1) f32 pads to (rb,128)) + slack.  Stays well under 64 MiB (v7x).
    vmem_limit = int(4 * rb * cb * itemsize + 4 * rb * 512 + (2 << 20))
    vmem_limit = min(max(vmem_limit, 8 << 20), 48 << 20)

    kwargs = {}
    if donate_input and jnp.dtype(x.dtype) == out_dtype:
        kwargs["input_output_aliases"] = {0: 0}

    out2 = pl.pallas_call(
        _normalize_kernel,
        out_shape=jax.ShapeDtypeStruct((rows, cols), out_dtype),
        grid=grid,
        in_specs=[x_spec, const_spec, const_spec],
        out_specs=x_spec,
        compiler_params=pltpu.CompilerParams(
            dimension_semantics=("parallel", "parallel"),
            vmem_limit_bytes=vmem_limit,
        ),
        cost_estimate=pl.CostEstimate(
            flops=2 * rows * cols,
            transcendentals=0,
            bytes_accessed=rows * cols * (in_item + out_item) + 8 * rb,
        ),
        **kwargs,
    )(x2, scale_blk, bias_blk)

    return out2.reshape(N, C, H, W)


class ImageNormalizer:
    """Mirrors the PyTorch module: buffers mean/std viewed as (1, 3, 1, 1)."""

    def __init__(self, mean, std):
        self.mean = jnp.asarray(mean, dtype=jnp.float32).reshape(1, 3, 1, 1)
        self.std = jnp.asarray(std, dtype=jnp.float32).reshape(1, 3, 1, 1)

    def __call__(self, inp):
        if isinstance(inp, tuple):
            return (image_normalize(inp[0], self.mean, self.std), inp[1])
        return image_normalize(inp, self.mean, self.std)


if __name__ == "__main__":
    key = jax.random.PRNGKey(0)
    N, C, H, W = 2, 3, 16, 16  # module hard-codes 3 channels via view(1, 3, 1, 1)
    x = jax.random.uniform(key, (N, C, H, W), dtype=jnp.float32)

    # Standard ImageNet normalization constants.
    mean = (0.485, 0.456, 0.406)
    std = (0.229, 0.224, 0.225)
    model = ImageNormalizer(mean, std)

    out = jax.block_until_ready(model(x))
    ref = (x - model.mean) / model.std
    assert out.shape == x.shape and out.dtype == jnp.float32
    assert jnp.allclose(out, ref, atol=1e-5, rtol=1e-5)

    # Tuple-input path (second element passed through untouched).
    labels = jnp.arange(N, dtype=jnp.int32)
    out_t = model((x, labels))
    jax.block_until_ready(out_t[0])
    assert jnp.allclose(out_t[0], ref, atol=1e-5, rtol=1e-5)
    assert jnp.array_equal(out_t[1], labels)

    # Non-128-divisible spatial extent (ragged last lane block) + more rows.
    x2 = jax.random.uniform(jax.random.PRNGKey(1), (4, 3, 56, 72),
                            dtype=jnp.float32)
    ref2 = (x2 - model.mean) / model.std
    out2 = jax.block_until_ready(model(x2))
    assert jnp.allclose(out2, ref2, atol=1e-5, rtol=1e-5)

    # Integer input promotes to float32 (torch: int - f32 buffer -> f32).
    x_i = jax.random.randint(jax.random.PRNGKey(2), (2, 3, 32, 40), 0, 256,
                             dtype=jnp.int32)
    out_i = jax.block_until_ready(model(x_i))
    ref_i = (x_i.astype(jnp.float32) - model.mean) / model.std
    assert out_i.dtype == jnp.float32
    assert jnp.allclose(out_i, ref_i, atol=1e-4, rtol=1e-4)

    print("KERNEL_OK")
</pallas_src>

<mosaic_0001>
module attributes {stable_mosaic.version = 11 : i64} {
  func.func @_normalize_kernel(%arg0: i32, %arg1: i32, %arg2: memref<6x128xf32, #tpu.memory_space<vmem>>, %arg3: memref<6x1xf32, #tpu.memory_space<vmem>>, %arg4: memref<6x1xf32, #tpu.memory_space<vmem>>, %arg5: memref<6x128xf32, #tpu.memory_space<vmem>>) attributes {dimension_semantics = [#tpu.dimension_semantics<parallel>, #tpu.dimension_semantics<parallel>], iteration_bounds = array<i64: 1, 2>, scalar_prefetch = 0 : i64, scratch_operands = 0 : i64, tpu.core_type = #tpu.core_type<tc>, window_params = [{transform_indices = @transform_0, window_bounds = array<i64: 6, 128>}, {pipeline_mode = #tpu.pipeline_mode<synchronous>, transform_indices = @transform_1, window_bounds = array<i64: 6, 1>}, {pipeline_mode = #tpu.pipeline_mode<synchronous>, transform_indices = @transform_2, window_bounds = array<i64: 6, 1>}, {transform_indices = @transform_3, window_bounds = array<i64: 6, 128>}]} {
    %c0 = arith.constant 0 : index
    %c0_0 = arith.constant 0 : index
    %0 = vector.load %arg2[%c0, %c0_0] : memref<6x128xf32, #tpu.memory_space<vmem>>, vector<6x128xf32>
    %c0_1 = arith.constant 0 : index
    %c0_2 = arith.constant 0 : index
    %1 = vector.load %arg3[%c0_1, %c0_2] : memref<6x1xf32, #tpu.memory_space<vmem>>, vector<6x1xf32>
    %2 = vector.broadcast %1 : vector<6x1xf32> to vector<6x128xf32>
    %3 = arith.mulf %0, %2 : vector<6x128xf32>
    %c0_3 = arith.constant 0 : index
    %c0_4 = arith.constant 0 : index
    %4 = vector.load %arg4[%c0_3, %c0_4] : memref<6x1xf32, #tpu.memory_space<vmem>>, vector<6x1xf32>
    %5 = vector.broadcast %4 : vector<6x1xf32> to vector<6x128xf32>
    %6 = arith.addf %3, %5 : vector<6x128xf32>
    %c0_5 = arith.constant 0 : index
    %c0_6 = arith.constant 0 : index
    %7 = vector.load %arg5[%c0_5, %c0_6] : memref<6x128xf32, #tpu.memory_space<vmem>>, vector<6x128xf32>
    tpu.vector_store %arg5[%c0_5, %c0_6], %6 {strides = array<i32>} : memref<6x128xf32, #tpu.memory_space<vmem>>, vector<6x128xf32>,
    return
  }
  func.func @transform_0(%arg0: i32, %arg1: i32) -> (i32, i32) {
    %c0_i32 = arith.constant 0 : i32
    return %arg0, %arg1 : i32, i32
  }
  func.func @transform_1(%arg0: i32, %arg1: i32) -> (i32, i32) {
    %c0_i32 = arith.constant 0 : i32
    %c0_i32_0 = arith.constant 0 : i32
    %c0_i32_1 = arith.constant 0 : i32
    return %c0_i32, %c0_i32_0 : i32, i32
  }
  func.func @transform_2(%arg0: i32, %arg1: i32) -> (i32, i32) {
    %c0_i32 = arith.constant 0 : i32
    %c0_i32_0 = arith.constant 0 : i32
    %c0_i32_1 = arith.constant 0 : i32
    return %c0_i32, %c0_i32_0 : i32, i32
  }
  func.func @transform_3(%arg0: i32, %arg1: i32) -> (i32, i32) {
    %c0_i32 = arith.constant 0 : i32
    return %arg0, %arg1 : i32, i32
  }
}

</mosaic_0001>

<bundles_post_ra>
// kernel: tpu_custom_call.1
= control target key start
LH: loop header
LB: loop body
LE: loop exit
PB: predicated region body
PF: predicated region fallthrough
CT: control target
= control target key end

     0   :  { %8 = vsyncpa [#allocation3], 0  ;;  %s575_s0 = inlined_call_operand.vmem [shape: f32[6,256], index: 0, kind: input, shape index: {}]   ;;  %s576_s1 = inlined_call_operand.vmem [shape: f32[6,1], index: 1, kind: input, shape index: {}]   ;;  %s577_s2 = inlined_call_operand.vmem [shape: f32[6,1], index: 2, kind: input, shape index: {}]   ;;  %s578_s3 = inlined_call_operand.hbm [shape: f32[6,256], index: 3, kind: output, shape index: {}]  }
   0x1   :  { %10 = vsyncpa [#allocation3 + $0x1], 0  ;;  %s472_s12 = smov 0   ;;  %s474_s13 = smov 0  }
   0x2   :  { %s476_s14 = smov 0   ;;  %s478_s15 = smov 0  }
   0x3   :  { %s480_s16 = smov 0   ;;  %s482_s17 = smov 0  }
   0x4 LB: > { %s303_s18 = sadd.s32 4294967295, %s449_s17   ;;  %s304_s19 = sadd.s32 4294967294, %s449_s17   ;;  %s449_s17 = sphi %s482_s17, %s16_s17   ;;  %s445_s16 = sphi %s480_s16, %s585_s16   ;;  %s441_s15 = sphi %s478_s15, %s584_s15   ;;  %s437_s14 = sphi %s476_s14, %s583_s14   ;;  %s433_s13 = sphi %s474_s13, %s582_s13   ;;  %s429_s12 = sphi %s472_s12, %s581_s12  }
   0x5   : > { %s25_s20 = sadd.s32 1, %s445_s16  ;;  %s107_s21 = sadd.s32 1, %s437_s14 }
   0x6   : > { %p26_p0 = scmp.ge.s32.totalorder %s25_s20, 2  ;;  %p117_p1 = scmp.ne.s32.totalorder %s437_s14, %s433_s13 }
   0x7   : > { %p118_p2 = scmp.eq.s32.totalorder %s303_s18, 1  ;;  %p123_p3 = scmp.ne.s32.totalorder %s433_s13, %s429_s12 }
   0x8   : > { %s587_s20 = smov (%p26_p0, %s25_s20), 0  ;;  %p124_p5 = scmp.eq.s32.totalorder %s304_s19, 1 }
   0x9   : > { %p512_p4 = por %p118_p2, %p117_p1  ;;  %s103_s23 = ssub.s32 %s445_s16, %s587_s20 }
   0xa   : > { %p307_p6 = scmp.ge.s32.totalorder %s449_s17, 1  ;;  %p105_p7 = scmp.eq.s32.totalorder %s103_s23, 0 }
   0xb   : > { %p519_p8 = por %p124_p5, %p123_p3  ;;  %p159_p9 = scmp.lt.s32.totalorder %s449_s17, 3 }
   0xc   : > { %s525_s25 = scalar_select %p105_p7, %s437_s14, %s107_s21  }
   0xd   : > { %p160_p10 = pnand %p307_p6, %p159_p9 }
   0xe   : > { %p188_p11 = scmp.lt.s32.totalorder (!%p160_p10), %s441_s15, 1  ;;  %s183_s4 = sand.u32 (!%p160_p10), 1, %s433_s13  }
   0xf   : > { %163 = sbr.rel (%p160_p10) target bundleno = 150 (0x96), region = 32  ;;  %s308_s6 = sshll.u32 (!%p160_p10), %s183_s4, 3 }
  0x10   : > { %s311_s7 = sshll.u32 (!%p160_p10), %s441_s15, 3  ;;  %s185_s21 = scalar_lea.vmem (!%p160_p10), [#allocation2], %s308_s6 }
  0x11   : > { %s223_s19 = scalar_lea.hbm (!%p160_p10), %s578_s3, %s311_s7  ;;  %s225_s23 = sshll.u32 (!%p160_p10), %s185_s21, 4  ;;  %s226_s23 = int_to_ptr.vmem [resolvable:$true] %s225_s23 }
  0x12   : > { %s227_s26 = sshll.u32 (!%p160_p10), %s223_s19, 4  ;;  %s228_s26 = int_to_ptr.hbm [resolvable:$true] %s227_s26 }
  0x13   : > { %s385_s27 = sshra.s32 (!%p160_p10), %s228_s26, 4  ;;  %s386_s27 = int_to_ptr.hbm [resolvable:$true] %s385_s27 }
  0x14   : > { %v195_v0 = vld [vmem:[%s576_s1] sm:$0x3f]  ;;  %v451_v1 = vmov 0   ;;  %s189_s30 = scalar_select %p188_p11, %s441_s15, 1 }
  0x15   : > { %370 = vset.pattern.permute.xlu0 %v451_v1  ;;  %v202_v2 = vld [vmem:[%s577_s2] sm:$0x3f]  ;;  %s211_s15 = scalar_lea.sflag [#allocation3], %s183_s4  ;;  %s387_s28 = scalar_lea.hbm %s386_s27, 8 }
  0x16   : > { %198 = vperm.xlu0 %370, %v195_v0   ;;  %s309_s5 = sshll.u32 %s189_s30, 3  ;;  %p388_p12 = scmp.ne.s32.totalorder %s386_s27, %s387_s28 }
  0x17   : > { %s193_s10 = scalar_lea.vmem %s575_s0, %s309_s5  ;;  %s391_s5 = scalar_lea.hbm %s578_s3, 16 }
  0x18   : > { %v194_v4 = vld [vmem:[%s193_s10] sm:$0x3f]  ;;  %p389_p13 = pnand %p388_p12, %p512_p4  ;;  %p392_p1 = scmp.lt.s32.totalorder %s386_s27, %s578_s3 }
  0x19   : > { %p393_p2 = scmp.lt.s32.totalorder %s391_s5, %s387_s28 }
  0x1a   : > { %p390_p0 = pneg %p389_p13 }
  0x1b   : > { %p394_p3 = por %p393_p2, %p392_p1 }
  0x1d   : > { %p395_p5 = pnand %p394_p3, %p390_p0 }
  0x1e   : > { %205 = vperm.xlu0 %370, %v202_v2  }
  0x88   : > { %v199_v3 = vpop.permute.xlu0 %198 }
  0x89   : > { %v201_v5 = vmul.f32 %v199_v3, %v194_v4 }
  0x90   : > { %v206_v6 = vpop.permute.xlu0 %205 }
  0x91   : > { %v208_v7 = vadd.f32 %v206_v6, %v201_v5 }
  0x93   : > { %209 = vst [vmem:[%s185_s21] sm:$0x3f] %v208_v7 }
  0x94   : > { %398 = shalt.err (!%p395_p5)
}
  0x95   : > { %314 = dma.vmem_to_hbm [thread:$0]  (%p512_p4), %s226_s23, 128, %s228_s26, %s211_s15  }
  0x96 PF: > { %p320_p6 = scmp.ge.s32.totalorder %s449_s17, 2  ;;  %s239_s4 = sand.u32 1, %s429_s12  }
  0x97   : > { %s240_s8 = scalar_lea.sflag [#allocation3], %s239_s4 }
  0x98   : > { %p317_p7 = pnand %p320_p6, %p519_p8 }
  0x9a   : > { %p318_p9 = pneg %p317_p7 }
  0x9c   : > { %424 = dma.done.wait (%p318_p9), %s240_s8, 128  }
  0x9d   : > { %426 = vsyncadd (%p318_p9), %s240_s8, 4294967168  ;;  %s16_s17 = sadd.s32 1, %s449_s17   ;;  %s581_s12 = smov %s433_s13 }
  0x9e   : > { %p13_p10 = scmp.ge.s32.totalorder %s16_s17, 4   ;;  %s582_s13 = smov %s437_s14 }
  0x9f   : > { %s583_s14 = smov %s525_s25  ;;  %s584_s15 = smov %s445_s16 }
  0xa0   : > { %s585_s16 = smov %s587_s20  ;;  %15 = sbr.rel (!%p13_p10) target bundleno = 4 (0x4), region = 67 }
  0xa5   :  { %246 = vsyncpa [#allocation3], 1 }
  0xa6   :  { %248 = vsyncpa [#allocation3 + $0x1], 1 }

</bundles_post_ra>
